<compile_context>
chip_gen: v7x
topology: tpu7x:2x2x1
jax: 0.10.0
libtpu: 0.0.40
codegen_flags: <defaults>
</compile_context>

<pallas_src>
import functools

import jax
import jax.numpy as jnp
from jax.experimental import pallas as pl
from jax.experimental.pallas import tpu as pltpu


def _round_up(x, m):
    return ((x + m - 1) // m) * m


def _vmem_budget_bytes():
    """Usable scoped-VMEM budget for this chip generation."""
    try:
        cap = int(pltpu.get_tpu_info().vmem_capacity_bytes)
    except Exception:
        cap = 64 << 20  # conservative default (v7x-sized VMEM)
    headroom = max(16 << 20, cap // 8)  # Mosaic internal scratch, spill room
    return max(cap - headroom, 16 << 20)


def _vmem_need_bytes(tm, tn, nj, in_features, rank, x_isz, p_isz):
    n = 2 * tm * in_features * x_isz            # x tile, double-buffered
    n += 2 * tm * tn * x_isz                    # out tile, double-buffered
    n += in_features * rank * p_isz             # A, single-buffered (const idx)
    n += (1 if nj == 1 else 2) * rank * tn * p_isz  # B
    if nj > 1:
        n += tm * rank * 4                      # cached (x @ A) scratch, f32
    return n


def _select_tiles(M, in_features, out_features, rank, x_isz, p_isz, budget,
                  sublane, tm_max):
    tm = min(_round_up(tm_max, sublane), _round_up(max(M, 1), sublane))
    # Give the row ("parallel") axis at least 2 blocks so v7x's two
    # TensorCores both get work; negligible cost on single-TC chips.
    if M > sublane and pl.cdiv(M, tm) < 2:
        tm = max(sublane, _round_up(pl.cdiv(M, 2), sublane))

    while True:
        # Prefer a single full-width out_features block: no per-j grid-step
        # overhead and no recompute / re-read across j.
        if _vmem_need_bytes(tm, out_features, 1, in_features, rank,
                            x_isz, p_isz) <= budget:
            return tm, out_features, 1
        # Otherwise tile out_features in multiples of 128 (cached-xa path),
        # using the largest tn that fits so j has as few steps as possible.
        if out_features % 128 == 0:
            tn = (out_features // 2) // 128 * 128
            while tn >= 128:
                nj = pl.cdiv(out_features, tn)
                if _vmem_need_bytes(tm, tn, nj, in_features, rank,
                                    x_isz, p_isz) <= budget:
                    return tm, tn, nj
                tn = (tn // 2) // 128 * 128
        if tm <= sublane:
            break
        tm = max(sublane, _round_up(tm // 2, sublane))

    # Pathological fallback (gigantic in_features): smallest row tile.
    # TODO(synk): add a K-axis (in_features) reduction grid for this case.
    if out_features % 128 == 0 and out_features > 128:
        return sublane, 128, pl.cdiv(out_features, 128)
    return sublane, out_features, 1


def _lora_kernel_fused(x_ref, a_ref, b_ref, o_ref, *, scale):
    # (tm, in) @ (in, r) -> (tm, r), f32 accumulation on the MXU.
    xa = jnp.dot(x_ref[...], a_ref[...], preferred_element_type=jnp.float32)
    # Scale the rank-sized intermediate (tm*rank elements, not tm*out).
    xa = xa * scale
    if b_ref.dtype != jnp.float32:
        xa = xa.astype(b_ref.dtype)  # native narrow-dtype MXU path for dot #2
    out = jnp.dot(xa, b_ref[...], preferred_element_type=jnp.float32)
    o_ref[...] = out.astype(o_ref.dtype)


def _lora_kernel_tiled(x_ref, a_ref, b_ref, o_ref, xa_ref, *, scale):
    # j (out_features tile) is the innermost, "arbitrary" grid axis; compute
    # the rank-sized intermediate once per row tile and reuse it across j.
    @pl.when(pl.program_id(1) == 0)
    def _():
        xa_ref[...] = (
            jnp.dot(x_ref[...], a_ref[...], preferred_element_type=jnp.float32)
            * scale)

    xa = xa_ref[...]
    if b_ref.dtype != jnp.float32:
        xa = xa.astype(b_ref.dtype)
    out = jnp.dot(xa, b_ref[...], preferred_element_type=jnp.float32)
    o_ref[...] = out.astype(o_ref.dtype)


def lora_update(x, A, B, alpha, rank, *, tm_max=1024, force_tiles=None):
    """out = x @ A @ B * alpha / rank, with x: (..., in_features)."""
    in_features, r = A.shape
    r2, out_features = B.shape
    assert r == r2 == rank

    lead = x.shape[:-1]
    M = 1
    for d in lead:
        M *= d
    x2d = x.reshape(M, in_features)

    # Match parameter dtype to the activation dtype when x is bf16 so both
    # matmuls run the native bf16 MXU path (no mixed-precision promotion).
    if x.dtype == jnp.bfloat16:
        A = A.astype(jnp.bfloat16)
        B = B.astype(jnp.bfloat16)

    scale = float(alpha) / float(rank)

    x_isz = jnp.dtype(x.dtype).itemsize
    p_isz = jnp.dtype(A.dtype).itemsize
    # Dtype-aware sublane multiple: f32 -> 8, bf16 -> 16, int8/fp8 -> 32.
    sublane = 8 * max(1, 4 // x_isz)

    budget = _vmem_budget_bytes()
    if force_tiles is not None:
        tm, tn = force_tiles
        nj = pl.cdiv(out_features, tn)
    else:
        tm, tn, nj = _select_tiles(M, in_features, out_features, r,
                                   x_isz, p_isz, budget, sublane, tm_max)
    ni = pl.cdiv(M, tm)

    vmem_need = _vmem_need_bytes(tm, tn, nj, in_features, r, x_isz, p_isz)
    vmem_limit = int(min(budget, max(vmem_need + (8 << 20), 32 << 20)))

    cost = pl.CostEstimate(
        flops=2 * M * in_features * r + 2 * M * r * out_features,
        transcendentals=0,
        bytes_accessed=(M * (in_features + out_features) * x_isz
                        + (in_features * r + r * out_features) * p_isz),
    )

    out_shape = jax.ShapeDtypeStruct((M, out_features), x.dtype)

    def run(single_buffer_const):
        def maybe_single(shape, index_map):
            if single_buffer_const:
                return pl.BlockSpec(shape, index_map,
                                    pipeline_mode=pl.Buffered(1))
            return pl.BlockSpec(shape, index_map)

        if nj == 1:
            grid = (ni,)
            in_specs = [
                pl.BlockSpec((tm, in_features), lambda i: (i, 0)),
                maybe_single((in_features, r), lambda i: (0, 0)),
                maybe_single((r, out_features), lambda i: (0, 0)),
            ]
            out_specs = pl.BlockSpec((tm, out_features), lambda i: (i, 0))
            scratch = []
            kernel = functools.partial(_lora_kernel_fused, scale=scale)
            dims = ("parallel",)
        else:
            grid = (ni, nj)
            in_specs = [
                pl.BlockSpec((tm, in_features), lambda i, j: (i, 0)),
                maybe_single((in_features, r), lambda i, j: (0, 0)),
                pl.BlockSpec((r, tn), lambda i, j: (0, j)),
            ]
            out_specs = pl.BlockSpec((tm, tn), lambda i, j: (i, j))
            scratch = [pltpu.VMEM((tm, r), jnp.float32)]
            kernel = functools.partial(_lora_kernel_tiled, scale=scale)
            # j carries the cached intermediate -> must stay sequential.
            dims = ("parallel", "arbitrary")

        return pl.pallas_call(
            kernel,
            out_shape=out_shape,
            grid_spec=pltpu.PrefetchScalarGridSpec(
                num_scalar_prefetch=0,
                grid=grid,
                in_specs=in_specs,
                out_specs=out_specs,
                scratch_shapes=scratch,
            ),
            compiler_params=pltpu.CompilerParams(
                dimension_semantics=dims,
                vmem_limit_bytes=vmem_limit,
            ),
            cost_estimate=cost,
        )(x2d, A, B)

    try:
        out2d = run(True)
    except Exception:
        # Fallback for jax builds that reject pipeline_mode=pl.Buffered(1):
        # use default double-buffering for the constant-index blocks.
        out2d = run(False)

    return out2d.reshape(*lead, out_features)


if __name__ == "__main__":
    # Small shapes consistent with the module's forward:
    #   batch=2, seq=8, in_features=32, out_features=32, rank=4, alpha=8
    batch, seq = 2, 8
    in_features, out_features, rank, alpha = 32, 32, 4, 8

    key = jax.random.PRNGKey(0)
    kx, ka, kb, kb2 = jax.random.split(key, 4)

    x = jax.random.normal(kx, (batch, seq, in_features), dtype=jnp.float32)

    # Parameter init per LoRAUpdate.__init__: A ~ xavier_normal, B = zeros.
    # B also gets a small non-zero variant so the checks exercise the second
    # matmul (with B = 0 the output is trivially zero).
    xavier_std = (2.0 / (in_features + rank)) ** 0.5
    A = xavier_std * jax.random.normal(ka, (in_features, rank), dtype=jnp.float32)
    B = 0.1 * jax.random.normal(kb, (rank, out_features), dtype=jnp.float32)

    # --- f32, fused single out_features block path ------------------------
    out = jax.block_until_ready(lora_update(x, A, B, alpha, rank))
    ref = (x @ A @ B) * alpha / rank
    assert out.shape == (batch, seq, out_features)
    assert jnp.allclose(out, ref, atol=1e-5, rtol=1e-5), "f32 fused mismatch"

    # --- PyTorch default B = 0 (zero update) -------------------------------
    out_zero = jax.block_until_ready(
        lora_update(x, A, jnp.zeros((rank, out_features), jnp.float32),
                    alpha, rank))
    assert jnp.allclose(out_zero, 0.0), "B=0 should give a zero update"

    # --- f32, forced out_features tiling (cached-xa / arbitrary-j path) ----
    out_features2 = 256
    B2 = 0.1 * jax.random.normal(kb2, (rank, out_features2), dtype=jnp.float32)
    out2 = jax.block_until_ready(
        lora_update(x, A, B2, alpha, rank, force_tiles=(8, 128)))
    ref2 = (x @ A @ B2) * alpha / rank
    assert jnp.allclose(out2, ref2, atol=1e-5, rtol=1e-5), "tiled-j mismatch"

    # --- bf16 activations (weights cast to bf16, native MXU path) ----------
    xb = x.astype(jnp.bfloat16)
    outb = jax.block_until_ready(lora_update(xb, A, B, alpha, rank))
    refb = (xb.astype(jnp.float32) @ A @ B) * alpha / rank
    assert jnp.allclose(outb.astype(jnp.float32), refb, atol=5e-2, rtol=5e-2), \
        "bf16 mismatch"

    print("KERNEL_OK")
</pallas_src>

<mosaic_0001>
module attributes {stable_mosaic.version = 11 : i64} {
  func.func @_lora_kernel_fused(%arg0: i32, %arg1: memref<8x32xf32, #tpu.memory_space<vmem>>, %arg2: memref<32x4xf32, #tpu.memory_space<vmem>>, %arg3: memref<4x32xf32, #tpu.memory_space<vmem>>, %arg4: memref<8x32xf32, #tpu.memory_space<vmem>>) attributes {dimension_semantics = [#tpu.dimension_semantics<parallel>], iteration_bounds = array<i64: 2>, scalar_prefetch = 0 : i64, scratch_operands = 0 : i64, tpu.core_type = #tpu.core_type<tc>, window_params = [{transform_indices = @transform_0, window_bounds = array<i64: 8, 32>}, {pipeline_mode = #tpu.pipeline_mode<synchronous>, transform_indices = @transform_1, window_bounds = array<i64: 32, 4>}, {pipeline_mode = #tpu.pipeline_mode<synchronous>, transform_indices = @transform_2, window_bounds = array<i64: 4, 32>}, {transform_indices = @transform_3, window_bounds = array<i64: 8, 32>}]} {
    %c0 = arith.constant 0 : index
    %c0_0 = arith.constant 0 : index
    %0 = vector.load %arg1[%c0, %c0_0] : memref<8x32xf32, #tpu.memory_space<vmem>>, vector<8x32xf32>
    %c0_1 = arith.constant 0 : index
    %c0_2 = arith.constant 0 : index
    %1 = vector.load %arg2[%c0_1, %c0_2] : memref<32x4xf32, #tpu.memory_space<vmem>>, vector<32x4xf32>
    %cst = arith.constant dense<0.000000e+00> : vector<8x4xf32>
    %2 = tpu.matmul %0, %1, %cst {dimension_numbers = #tpu.dot_dimension_numbers<[1], [0], [0], [1], [0, 0, 1, 1], [], []>} : vector<8x32xf32>, vector<32x4xf32>, vector<8x4xf32> -> vector<8x4xf32>
    %cst_3 = arith.constant 2.000000e+00 : f32
    %3 = vector.broadcast %cst_3 : f32 to vector<8x4xf32>
    %4 = arith.mulf %2, %3 : vector<8x4xf32>
    %c0_4 = arith.constant 0 : index
    %c0_5 = arith.constant 0 : index
    %5 = vector.load %arg3[%c0_4, %c0_5] : memref<4x32xf32, #tpu.memory_space<vmem>>, vector<4x32xf32>
    %cst_6 = arith.constant dense<0.000000e+00> : vector<8x32xf32>
    %6 = tpu.matmul %4, %5, %cst_6 {dimension_numbers = #tpu.dot_dimension_numbers<[1], [0], [0], [1], [0, 0, 1, 1], [], []>} : vector<8x4xf32>, vector<4x32xf32>, vector<8x32xf32> -> vector<8x32xf32>
    %c0_7 = arith.constant 0 : index
    %c0_8 = arith.constant 0 : index
    %7 = vector.load %arg4[%c0_7, %c0_8] : memref<8x32xf32, #tpu.memory_space<vmem>>, vector<8x32xf32>
    tpu.vector_store %arg4[%c0_7, %c0_8], %6 {strides = array<i32>} : memref<8x32xf32, #tpu.memory_space<vmem>>, vector<8x32xf32>,
    return
  }
  func.func @transform_0(%arg0: i32) -> (i32, i32) {
    %c0_i32 = arith.constant 0 : i32
    %c0_i32_0 = arith.constant 0 : i32
    return %arg0, %c0_i32 : i32, i32
  }
  func.func @transform_1(%arg0: i32) -> (i32, i32) {
    %c0_i32 = arith.constant 0 : i32
    %c0_i32_0 = arith.constant 0 : i32
    %c0_i32_1 = arith.constant 0 : i32
    return %c0_i32, %c0_i32_0 : i32, i32
  }
  func.func @transform_2(%arg0: i32) -> (i32, i32) {
    %c0_i32 = arith.constant 0 : i32
    %c0_i32_0 = arith.constant 0 : i32
    %c0_i32_1 = arith.constant 0 : i32
    return %c0_i32, %c0_i32_0 : i32, i32
  }
  func.func @transform_3(%arg0: i32) -> (i32, i32) {
    %c0_i32 = arith.constant 0 : i32
    %c0_i32_0 = arith.constant 0 : i32
    return %arg0, %c0_i32 : i32, i32
  }
}

module attributes {stable_mosaic.version = 11 : i64} {
  func.func @_lora_kernel_fused(%arg0: i32, %arg1: memref<8x32xf32, #tpu.memory_space<vmem>>, %arg2: memref<32x4xf32, #tpu.memory_space<vmem>>, %arg3: memref<4x32xf32, #tpu.memory_space<vmem>>, %arg4: memref<8x32xf32, #tpu.memory_space<vmem>>) attributes {dimension_semantics = [#tpu.dimension_semantics<parallel>], iteration_bounds = array<i64: 2>, scalar_prefetch = 0 : i64, scratch_operands = 0 : i64, tpu.core_type = #tpu.core_type<tc>, window_params = [{transform_indices = @transform_0, window_bounds = array<i64: 8, 32>}, {pipeline_mode = #tpu.pipeline_mode<synchronous>, transform_indices = @transform_1, window_bounds = array<i64: 32, 4>}, {pipeline_mode = #tpu.pipeline_mode<synchronous>, transform_indices = @transform_2, window_bounds = array<i64: 4, 32>}, {transform_indices = @transform_3, window_bounds = array<i64: 8, 32>}]} {
    %c0 = arith.constant 0 : index
    %c0_0 = arith.constant 0 : index
    %0 = vector.load %arg1[%c0, %c0_0] : memref<8x32xf32, #tpu.memory_space<vmem>>, vector<8x32xf32>
    %c0_1 = arith.constant 0 : index
    %c0_2 = arith.constant 0 : index
    %1 = vector.load %arg2[%c0_1, %c0_2] : memref<32x4xf32, #tpu.memory_space<vmem>>, vector<32x4xf32>
    %cst = arith.constant dense<0.000000e+00> : vector<8x4xf32>
    %2 = tpu.matmul %0, %1, %cst {dimension_numbers = #tpu.dot_dimension_numbers<[1], [0], [0], [1], [0, 0, 1, 1], [], []>} : vector<8x32xf32>, vector<32x4xf32>, vector<8x4xf32> -> vector<8x4xf32>
    %cst_3 = arith.constant 2.000000e+00 : f32
    %3 = vector.broadcast %cst_3 : f32 to vector<8x4xf32>
    %4 = arith.mulf %2, %3 : vector<8x4xf32>
    %c0_4 = arith.constant 0 : index
    %c0_5 = arith.constant 0 : index
    %5 = vector.load %arg3[%c0_4, %c0_5] : memref<4x32xf32, #tpu.memory_space<vmem>>, vector<4x32xf32>
    %cst_6 = arith.constant dense<0.000000e+00> : vector<8x32xf32>
    %6 = tpu.matmul %4, %5, %cst_6 {dimension_numbers = #tpu.dot_dimension_numbers<[1], [0], [0], [1], [0, 0, 1, 1], [], []>} : vector<8x4xf32>, vector<4x32xf32>, vector<8x32xf32> -> vector<8x32xf32>
    %c0_7 = arith.constant 0 : index
    %c0_8 = arith.constant 0 : index
    %7 = vector.load %arg4[%c0_7, %c0_8] : memref<8x32xf32, #tpu.memory_space<vmem>>, vector<8x32xf32>
    tpu.vector_store %arg4[%c0_7, %c0_8], %6 {strides = array<i32>} : memref<8x32xf32, #tpu.memory_space<vmem>>, vector<8x32xf32>,
    return
  }
  func.func @transform_0(%arg0: i32) -> (i32, i32) {
    %c0_i32 = arith.constant 0 : i32
    %c0_i32_0 = arith.constant 0 : i32
    return %arg0, %c0_i32 : i32, i32
  }
  func.func @transform_1(%arg0: i32) -> (i32, i32) {
    %c0_i32 = arith.constant 0 : i32
    %c0_i32_0 = arith.constant 0 : i32
    %c0_i32_1 = arith.constant 0 : i32
    return %c0_i32, %c0_i32_0 : i32, i32
  }
  func.func @transform_2(%arg0: i32) -> (i32, i32) {
    %c0_i32 = arith.constant 0 : i32
    %c0_i32_0 = arith.constant 0 : i32
    %c0_i32_1 = arith.constant 0 : i32
    return %c0_i32, %c0_i32_0 : i32, i32
  }
  func.func @transform_3(%arg0: i32) -> (i32, i32) {
    %c0_i32 = arith.constant 0 : i32
    %c0_i32_0 = arith.constant 0 : i32
    return %arg0, %c0_i32 : i32, i32
  }
}

</mosaic_0001>

<bundles_post_ra>
// kernel: tpu_custom_call.1
= control target key start
LH: loop header
LB: loop body
LE: loop exit
PB: predicated region body
PF: predicated region fallthrough
CT: control target
= control target key end

     0   :  { %8 = vsyncpa [#allocation3], 0  ;;  %s688_s0 = inlined_call_operand.vmem [shape: f32[16,32], index: 0, kind: input, shape index: {}]   ;;  %s689_s1 = inlined_call_operand.vmem [shape: f32[32,4], index: 1, kind: input, shape index: {}]   ;;  %s690_s2 = inlined_call_operand.vmem [shape: f32[4,32], index: 2, kind: input, shape index: {}]   ;;  %s691_s3 = inlined_call_operand.hbm [shape: f32[16,32], index: 3, kind: output, shape index: {}]  }
   0x1   :  { %10 = vsyncpa [#allocation3 + $0x1], 0  ;;  %s571_s12 = smov 0   ;;  %s573_s13 = smov 0  }
   0x2   :  { %s575_s14 = smov 0   ;;  %s577_s15 = smov 0  }
   0x3 LB: > { %s592_s16 = sadd.s32 4294967295, %s545_s15   ;;  %s399_s17 = sadd.s32 4294967294, %s545_s15   ;;  %s545_s15 = sphi %s577_s15, %s697_s15   ;;  %s541_s14 = sphi %s575_s14, %s696_s14   ;;  %s537_s13 = sphi %s573_s13, %s695_s13   ;;  %s533_s12 = sphi %s571_s12, %s694_s12  }
   0x4   : > { %s596_s18 = sadd.s32 1, %s545_s15   ;;  %s91_s19 = sadd.s32 1, %s541_s14 }
   0x5   : > { %s88_s20 = ssub.s32 %s545_s15, %s596_s18  ;;  %p101_p0 = scmp.ne.s32.totalorder %s541_s14, %s537_s13 }
   0x6   : > { %p89_p1 = scmp.eq.s32.totalorder %s88_s20, 0  ;;  %p102_p2 = scmp.eq.s32.totalorder %s592_s16, 1 }
   0x7   : > { %p107_p3 = scmp.ne.s32.totalorder %s537_s13, %s533_s12  ;;  %p108_p4 = scmp.eq.s32.totalorder %s399_s17, 1 }
   0x8   : > { %s607_s21 = scalar_select %p89_p1, %s541_s14, %s91_s19  }
   0x9   : > { %p609_p5 = por %p102_p2, %p101_p0  ;;  %p613_p6 = por %p108_p4, %p107_p3 }
   0xa   : > { %p402_p7 = scmp.ge.s32.totalorder %s545_s15, 1  ;;  %p139_p8 = scmp.lt.s32.totalorder %s545_s15, 3 }
   0xc   : > { %p140_p9 = pnand %p402_p7, %p139_p8 }
   0xd   : > { %v167_v0 = vld [vmem:[%s689_s1] sm:$0xff] (!%p140_p9)  ;;  %v168_v1 = vld [vmem:[%s689_s1 + $0x8] sm:$0xff] (!%p140_p9)  ;;  %v169_v2 = vld [vmem:[%s689_s1 + $0x10] sm:$0xff] (!%p140_p9)  ;;  %v547_v3 = vmov (!%p140_p9), 0.0|0.0   ;;  %vm548_vm0 = vmmov (!%p140_p9), 0   ;;  %v549_v6 = vmov (!%p140_p9), 0.0  }
   0xe   : > { %143 = sbr.rel (%p140_p9) target bundleno = 466 (0x1d2), region = 32  ;;  %435 = vmatprep.subr.bf16.mxu0 (!%p140_p9), %v547_v3  ;;  %v436_v4 = vpack.c.bf16 (!%p140_p9), %v168_v1, %v167_v0  ;;  %v170_v5 = vld [vmem:[%s689_s1 + $0x18] sm:$0xff] (!%p140_p9)  ;;  %427 = vmatprep.mubr.msk.f32.mxu0 (!%p140_p9), %vm548_vm0, %v549_v6  ;;  %p162_p10 = scmp.lt.s32.totalorder (!%p140_p9), %s592_s16, 1  ;;  %vm171_vm1 = vcmask (!%p140_p9), 261120   ;;  %v246_v9 = vld [vmem:[%s690_s2] sm:$0xf] (!%p140_p9) }
   0xf   : > { %430 = vmatprep.subr.mxu1 (!%p140_p9), %v549_v6  ;;  %432 = vmatprep.mubr.msk.f32.mxu1 (!%p140_p9), %vm548_vm0, %v549_v6  ;;  %v439_v7 = vpack.c.bf16 (!%p140_p9), %v170_v5, %v169_v2  ;;  %vm251_vm2 = vcmask (!%p140_p9), 1043456   ;;  %vm247_vm3 = vcmask (!%p140_p9), 31744   ;;  %s159_s17 = sand.u32 (!%p140_p9), 1, %s537_s13   ;;  %s409_s20 = sshll.u32 (!%p140_p9), %s592_s16, 7 }
  0x10   : > { %437 = vmatpush3.bf16.msra.mxu0 (!%p140_p9), %v436_v4  ;;  %431 = vmatpush3.msk.msra.mxu1 (!%p140_p9), %vm251_vm2, %v246_v9  ;;  %s403_s19 = sshll.u32 (!%p140_p9), %s159_s17, 3  ;;  %s645_s28 = scalar_lea.hbm (!%p140_p9), %s691_s3, %s409_s20 }
  0x11   : > { %438 = vmatprep.subr.bf16.mxu0 (!%p140_p9), %v547_v3  ;;  %s161_s24 = scalar_lea.vmem (!%p140_p9), [#allocation2], %s403_s19  ;;  %s327_s29 = scalar_lea.sflag (!%p140_p9), [#allocation3], %s159_s17 }
  0x12   : > { %s340_s25 = sshll.u32 (!%p140_p9), %s161_s24, 4  ;;  %s647_s25 = int_to_ptr.vmem [resolvable:$true] %s340_s25 }
  0x13   : > { %s483_s30 = scalar_lea.vmem (!%p140_p9), %s647_s25, 128 }
  0x14   : > { %440 = vmatpush3.bf16.msra.mxu0 (!%p140_p9), %v439_v7  ;;  %p484_p11 = scmp.ne.s32.totalorder (!%p140_p9), %s647_s25, %s483_s30 }
  0x15   : > { %s163_s5 = scalar_select %p162_p10, %s592_s16, 1 }
  0x16   : > { %p485_p12 = pnand %p484_p11, %p609_p5  ;;  %s550_s16 = smov [#allocation2]  }
  0x17   : > { %s404_s6 = sshll.u32 %s163_s5, 3  ;;  %s487_s4 = sshll.u32 %s550_s16, 4  ;;  %s488_s4 = int_to_ptr.vmem [resolvable:$false] %s487_s4 }
  0x18   : > { %s165_s9 = scalar_lea.vmem %s688_s0, %s404_s6  ;;  %p486_p13 = pneg %p485_p12 }
  0x19   : > { %v166_v8 = vld [vmem:[%s165_s9] sm:$0xff]  ;;  %s489_s5 = scalar_lea.vmem %s488_s4, 256  ;;  %p490_p0 = scmp.lt.s32.totalorder %s647_s25, %s488_s4 }
  0x1a   : > { %428 = vmatmul.mubr.msk.f32.vlgmr.msra.gmra.mrb[0].mxu0 %vm171_vm1, %v166_v8  ;;  %p491_p1 = scmp.lt.s32.totalorder %s489_s5, %s483_s30 }
  0x1c   : > { %p492_p2 = por %p491_p1, %p490_p0 }
  0x1e   : > { %p493_p3 = pnand %p492_p2, %p486_p13 }
  0xed   : > { %v241_v10 = vpop.f32.mrb[0].mxu0 }
  0xee   : > { %v245_v11 = vmul.f32 2.0, %v241_v10  ;;  %v429_v12 = vpop.f32.mrb[1].mxu0 }
  0xf0   : > { %433 = vmatmul.mubr.msk.f32.vlgmr.msra.gmra.mrb[0].mxu1 %vm247_vm3, %v245_v11 }
 0x1c3   : > { %v321_v13 = vpop.f32.mrb[0].mxu1 }
 0x1c4   : > { %325 = vst.msk [vmem:[%s161_s24] sm:$0xff] %vm171_vm1, %v321_v13  ;;  %v434_v14 = vpop.f32.mrb[1].mxu1 }
 0x1c5   : > { %496 = shalt.err (!%p493_p3)
}
 0x1c6   : > { %s497_s6 = scalar_lea.hbm %s645_s28, 128  ;;  %s501_s9 = scalar_lea.hbm %s691_s3, 256 }
 0x1c7   : > { %p498_p4 = scmp.ne.s32.totalorder %s645_s28, %s497_s6  ;;  %p502_p9 = scmp.lt.u32.totalorder %s645_s28, %s691_s3 }
 0x1c8   : > { %p503_p10 = scmp.lt.u32.totalorder %s501_s9, %s497_s6  ;;  %p505_p12 = scmp.lt.u32.totalorder %s497_s6, %s645_s28 }
 0x1c9   : > { %p499_p7 = pnand %p498_p4, %p609_p5 }
 0x1ca   : > { %p504_p11 = por %p503_p10, %p502_p9 }
 0x1cb   : > { %p500_p8 = pneg %p499_p7 }
 0x1cc   : > { %p506_p13 = por %p505_p12, %p504_p11 }
 0x1ce   : > { %p507_p0 = pnand %p506_p13, %p500_p8 }
 0x1d0   : > { %510 = shalt.err (!%p507_p0)
}
 0x1d1   : > { %441 = dma.vmem_to_hbm [thread:$0]  (%p609_p5), %s647_s25, 128, %s645_s28, %s327_s29  }
 0x1d2 PF: > { %p447_p1 = scmp.ge.s32.totalorder %s545_s15, 2  ;;  %s352_s17 = sand.u32 1, %s533_s12  }
 0x1d3   : > { %s353_s19 = scalar_lea.sflag [#allocation3], %s352_s17 }
 0x1d4   : > { %p444_p2 = pnand %p447_p1, %p613_p6 }
 0x1d6   : > { %528 = dma.done.wait (!%p444_p2), %s353_s19, 128  }
 0x1d7   : > { %530 = vsyncadd (!%p444_p2), %s353_s19, 4294967168  ;;  %p13_p3 = scmp.ge.s32.totalorder %s596_s18, 4   ;;  %s694_s12 = smov %s537_s13 }
 0x1d8   : > { %s695_s13 = smov %s541_s14  ;;  %s696_s14 = smov %s607_s21 }
 0x1d9   : > { %s697_s15 = smov %s596_s18  ;;  %15 = sbr.rel (!%p13_p3) target bundleno = 3 (0x3), region = 67 }
 0x1e0   :  { %358 = vsyncpa [#allocation3], 1 }
 0x1e1   :  { %360 = vsyncpa [#allocation3 + $0x1], 1 }

// kernel: tpu_custom_call.1
= control target key start
LH: loop header
LB: loop body
LE: loop exit
PB: predicated region body
PF: predicated region fallthrough
CT: control target
= control target key end

     0   :  { %8 = vsyncpa [#allocation3], 0  ;;  %s688_s0 = inlined_call_operand.vmem [shape: f32[16,32], index: 0, kind: input, shape index: {}]   ;;  %s689_s1 = inlined_call_operand.vmem [shape: f32[32,4], index: 1, kind: input, shape index: {}]   ;;  %s690_s2 = inlined_call_operand.vmem [shape: f32[4,32], index: 2, kind: input, shape index: {}]   ;;  %s691_s3 = inlined_call_operand.hbm [shape: f32[16,32], index: 3, kind: output, shape index: {}]  }
   0x1   :  { %10 = vsyncpa [#allocation3 + $0x1], 0  ;;  %s571_s12 = smov 0   ;;  %s573_s13 = smov 0  }
   0x2   :  { %s575_s14 = smov 0   ;;  %s577_s15 = smov 0  }
   0x3 LB: > { %s592_s16 = sadd.s32 4294967295, %s545_s15   ;;  %s399_s17 = sadd.s32 4294967294, %s545_s15   ;;  %s545_s15 = sphi %s577_s15, %s697_s15   ;;  %s541_s14 = sphi %s575_s14, %s696_s14   ;;  %s537_s13 = sphi %s573_s13, %s695_s13   ;;  %s533_s12 = sphi %s571_s12, %s694_s12  }
   0x4   : > { %s596_s18 = sadd.s32 1, %s545_s15   ;;  %s91_s19 = sadd.s32 1, %s541_s14 }
   0x5   : > { %s88_s20 = ssub.s32 %s545_s15, %s596_s18  ;;  %p101_p0 = scmp.ne.s32.totalorder %s541_s14, %s537_s13 }
   0x6   : > { %p89_p1 = scmp.eq.s32.totalorder %s88_s20, 0  ;;  %p102_p2 = scmp.eq.s32.totalorder %s592_s16, 1 }
   0x7   : > { %p107_p3 = scmp.ne.s32.totalorder %s537_s13, %s533_s12  ;;  %p108_p4 = scmp.eq.s32.totalorder %s399_s17, 1 }
   0x8   : > { %s607_s21 = scalar_select %p89_p1, %s541_s14, %s91_s19  }
   0x9   : > { %p609_p5 = por %p102_p2, %p101_p0  ;;  %p613_p6 = por %p108_p4, %p107_p3 }
   0xa   : > { %p402_p7 = scmp.ge.s32.totalorder %s545_s15, 1  ;;  %p139_p8 = scmp.lt.s32.totalorder %s545_s15, 3 }
   0xc   : > { %p140_p9 = pnand %p402_p7, %p139_p8 }
   0xd   : > { %v167_v0 = vld [vmem:[%s689_s1] sm:$0xff] (!%p140_p9)  ;;  %v168_v1 = vld [vmem:[%s689_s1 + $0x8] sm:$0xff] (!%p140_p9)  ;;  %v169_v2 = vld [vmem:[%s689_s1 + $0x10] sm:$0xff] (!%p140_p9)  ;;  %v547_v3 = vmov (!%p140_p9), 0.0|0.0   ;;  %vm548_vm0 = vmmov (!%p140_p9), 0   ;;  %v549_v6 = vmov (!%p140_p9), 0.0  }
   0xe   : > { %143 = sbr.rel (%p140_p9) target bundleno = 466 (0x1d2), region = 32  ;;  %435 = vmatprep.subr.bf16.mxu0 (!%p140_p9), %v547_v3  ;;  %v436_v4 = vpack.c.bf16 (!%p140_p9), %v168_v1, %v167_v0  ;;  %v170_v5 = vld [vmem:[%s689_s1 + $0x18] sm:$0xff] (!%p140_p9)  ;;  %427 = vmatprep.mubr.msk.f32.mxu0 (!%p140_p9), %vm548_vm0, %v549_v6  ;;  %p162_p10 = scmp.lt.s32.totalorder (!%p140_p9), %s592_s16, 1  ;;  %vm171_vm1 = vcmask (!%p140_p9), 261120   ;;  %v246_v9 = vld [vmem:[%s690_s2] sm:$0xf] (!%p140_p9) }
   0xf   : > { %430 = vmatprep.subr.mxu1 (!%p140_p9), %v549_v6  ;;  %432 = vmatprep.mubr.msk.f32.mxu1 (!%p140_p9), %vm548_vm0, %v549_v6  ;;  %v439_v7 = vpack.c.bf16 (!%p140_p9), %v170_v5, %v169_v2  ;;  %vm251_vm2 = vcmask (!%p140_p9), 1043456   ;;  %vm247_vm3 = vcmask (!%p140_p9), 31744   ;;  %s159_s17 = sand.u32 (!%p140_p9), 1, %s537_s13   ;;  %s409_s20 = sshll.u32 (!%p140_p9), %s592_s16, 7 }
  0x10   : > { %437 = vmatpush3.bf16.msra.mxu0 (!%p140_p9), %v436_v4  ;;  %431 = vmatpush3.msk.msra.mxu1 (!%p140_p9), %vm251_vm2, %v246_v9  ;;  %s403_s19 = sshll.u32 (!%p140_p9), %s159_s17, 3  ;;  %s645_s28 = scalar_lea.hbm (!%p140_p9), %s691_s3, %s409_s20 }
  0x11   : > { %438 = vmatprep.subr.bf16.mxu0 (!%p140_p9), %v547_v3  ;;  %s161_s24 = scalar_lea.vmem (!%p140_p9), [#allocation2], %s403_s19  ;;  %s327_s29 = scalar_lea.sflag (!%p140_p9), [#allocation3], %s159_s17 }
  0x12   : > { %s340_s25 = sshll.u32 (!%p140_p9), %s161_s24, 4  ;;  %s647_s25 = int_to_ptr.vmem [resolvable:$true] %s340_s25 }
  0x13   : > { %s483_s30 = scalar_lea.vmem (!%p140_p9), %s647_s25, 128 }
  0x14   : > { %440 = vmatpush3.bf16.msra.mxu0 (!%p140_p9), %v439_v7  ;;  %p484_p11 = scmp.ne.s32.totalorder (!%p140_p9), %s647_s25, %s483_s30 }
  0x15   : > { %s163_s5 = scalar_select %p162_p10, %s592_s16, 1 }
  0x16   : > { %p485_p12 = pnand %p484_p11, %p609_p5  ;;  %s550_s16 = smov [#allocation2]  }
  0x17   : > { %s404_s6 = sshll.u32 %s163_s5, 3  ;;  %s487_s4 = sshll.u32 %s550_s16, 4  ;;  %s488_s4 = int_to_ptr.vmem [resolvable:$false] %s487_s4 }
  0x18   : > { %s165_s9 = scalar_lea.vmem %s688_s0, %s404_s6  ;;  %p486_p13 = pneg %p485_p12 }
  0x19   : > { %v166_v8 = vld [vmem:[%s165_s9] sm:$0xff]  ;;  %s489_s5 = scalar_lea.vmem %s488_s4, 256  ;;  %p490_p0 = scmp.lt.s32.totalorder %s647_s25, %s488_s4 }
  0x1a   : > { %428 = vmatmul.mubr.msk.f32.vlgmr.msra.gmra.mrb[0].mxu0 %vm171_vm1, %v166_v8  ;;  %p491_p1 = scmp.lt.s32.totalorder %s489_s5, %s483_s30 }
  0x1c   : > { %p492_p2 = por %p491_p1, %p490_p0 }
  0x1e   : > { %p493_p3 = pnand %p492_p2, %p486_p13 }
  0xed   : > { %v241_v10 = vpop.f32.mrb[0].mxu0 }
  0xee   : > { %v245_v11 = vmul.f32 2.0, %v241_v10  ;;  %v429_v12 = vpop.f32.mrb[1].mxu0 }
  0xf0   : > { %433 = vmatmul.mubr.msk.f32.vlgmr.msra.gmra.mrb[0].mxu1 %vm247_vm3, %v245_v11 }
 0x1c3   : > { %v321_v13 = vpop.f32.mrb[0].mxu1 }
 0x1c4   : > { %325 = vst.msk [vmem:[%s161_s24] sm:$0xff] %vm171_vm1, %v321_v13  ;;  %v434_v14 = vpop.f32.mrb[1].mxu1 }
 0x1c5   : > { %496 = shalt.err (!%p493_p3)
}
 0x1c6   : > { %s497_s6 = scalar_lea.hbm %s645_s28, 128  ;;  %s501_s9 = scalar_lea.hbm %s691_s3, 256 }
 0x1c7   : > { %p498_p4 = scmp.ne.s32.totalorder %s645_s28, %s497_s6  ;;  %p502_p9 = scmp.lt.u32.totalorder %s645_s28, %s691_s3 }
 0x1c8   : > { %p503_p10 = scmp.lt.u32.totalorder %s501_s9, %s497_s6  ;;  %p505_p12 = scmp.lt.u32.totalorder %s497_s6, %s645_s28 }
 0x1c9   : > { %p499_p7 = pnand %p498_p4, %p609_p5 }
 0x1ca   : > { %p504_p11 = por %p503_p10, %p502_p9 }
 0x1cb   : > { %p500_p8 = pneg %p499_p7 }
 0x1cc   : > { %p506_p13 = por %p505_p12, %p504_p11 }
 0x1ce   : > { %p507_p0 = pnand %p506_p13, %p500_p8 }
 0x1d0   : > { %510 = shalt.err (!%p507_p0)
}
 0x1d1   : > { %441 = dma.vmem_to_hbm [thread:$0]  (%p609_p5), %s647_s25, 128, %s645_s28, %s327_s29  }
 0x1d2 PF: > { %p447_p1 = scmp.ge.s32.totalorder %s545_s15, 2  ;;  %s352_s17 = sand.u32 1, %s533_s12  }
 0x1d3   : > { %s353_s19 = scalar_lea.sflag [#allocation3], %s352_s17 }
 0x1d4   : > { %p444_p2 = pnand %p447_p1, %p613_p6 }
 0x1d6   : > { %528 = dma.done.wait (!%p444_p2), %s353_s19, 128  }
 0x1d7   : > { %530 = vsyncadd (!%p444_p2), %s353_s19, 4294967168  ;;  %p13_p3 = scmp.ge.s32.totalorder %s596_s18, 4   ;;  %s694_s12 = smov %s537_s13 }
 0x1d8   : > { %s695_s13 = smov %s541_s14  ;;  %s696_s14 = smov %s607_s21 }
 0x1d9   : > { %s697_s15 = smov %s596_s18  ;;  %15 = sbr.rel (!%p13_p3) target bundleno = 3 (0x3), region = 67 }
 0x1e0   :  { %358 = vsyncpa [#allocation3], 1 }
 0x1e1   :  { %360 = vsyncpa [#allocation3 + $0x1], 1 }

</bundles_post_ra>
